<compile_context>
chip_gen: v5e
topology: v5e:2x2
jax: 0.10.0
libtpu: 0.0.40
codegen_flags: <defaults>
</compile_context>

<pallas_src>
import jax
import jax.numpy as jnp
from jax.experimental import pallas as pl
from jax.experimental.pallas import tpu as pltpu


EMBED_DIM = 32          # encoder embed_dim
HIDDEN2 = 16
BN_EPS = 1e-5
LANE = 128

# 128-lane-aligned column blocks inside the single bf16 parameter slab
# (128 rows x 6*128 cols).  Real data sits in the top-left corner of each
# block; the zero padding keeps every MXU operand a full (128,128) tile and
# keeps padded output columns exactly zero.
COL_W1U = 0 * LANE      # W_ur1.T (32,32)  at rows 0:32, cols +0:32
COL_W1V = 1 * LANE      # W_vr1.T (32,32)  at rows 0:32, cols +32:64 (lane-shifted)
COL_W23 = 2 * LANE      # blockdiag(W_ur2.T,W_vr2.T) @ W_uv1.T (64,32) at rows 0:64
COL_W4 = 3 * LANE       # W_uv2.T (32,16)  at rows 0:32
COL_W5 = 4 * LANE       # W_uv3.T (16,1)   at rows 0:16, col +0
COL_R = 5 * LANE        # bias / gamma / beta rows (layout below), rows 0:16
W_SLAB_COLS = 6 * LANE

# row layout inside the COL_R block (each row zero-padded to 128 lanes)
(ROW_B1, ROW_G12, ROW_BT12, ROW_B23, ROW_G3,
 ROW_BT3, ROW_B4, ROW_G4, ROW_BT4, ROW_B5) = range(10)
N_ROWS = 16


def _bn_relu(x, gamma, beta, inv_b):
    """Training-mode BatchNorm1d (batch stats, biased variance) + ReLU.

    mean and E[x^2] come from ONE cross-sublane reduction over the
    lane-stacked [x | x*x] (one XLU pass instead of two serialized ones).
    Padded columns (x == 0, gamma == beta == 0) stay exactly 0.
    """
    stats = jnp.sum(jnp.concatenate([x, x * x], axis=1),
                    axis=0, keepdims=True) * inv_b          # (1, 2*LANE)
    mean = stats[:, :LANE]
    var = jnp.maximum(stats[:, LANE:] - mean * mean, 0.0)   # guard fp cancellation
    y = (x - mean) * jax.lax.rsqrt(var + BN_EPS) * gamma + beta
    return jnp.maximum(y, 0.0)


def mksf_kernel(u_ref, v_ref, w_ref, out_ref):
    d = EMBED_DIM
    inv_b = 1.0 / u_ref.shape[0]

    rows = w_ref[0:N_ROWS, COL_R:COL_R + LANE].astype(jnp.float32)   # (16,128)

    def row(i):
        return rows[i:i + 1, :]

    u = u_ref[...].astype(jnp.bfloat16)        # (B, 32)
    v = v_ref[...].astype(jnp.bfloat16)        # (B, 32)

    # stage 1:  [u@W_ur1 | v@W_vr1 | 0...] + b -> BN(1|2) -> ReLU       (B,128)
    # two independent sub-tile dots (pipeline in the MXU); no concat needed.
    h = (jnp.dot(u, w_ref[0:d, COL_W1U:COL_W1U + LANE],
                 preferred_element_type=jnp.float32)
         + jnp.dot(v, w_ref[0:d, COL_W1V:COL_W1V + LANE],
                   preferred_element_type=jnp.float32)
         + row(ROW_B1))
    a = _bn_relu(h, row(ROW_G12), row(ROW_BT12), inv_b)

    # stages 2+3 folded:  blockdiag(W_ur2,W_vr2)@W_uv1 -> BN3 -> ReLU   (B,128)
    h = jnp.dot(a.astype(jnp.bfloat16), w_ref[:, COL_W23:COL_W23 + LANE],
                preferred_element_type=jnp.float32) + row(ROW_B23)
    a = _bn_relu(h, row(ROW_G3), row(ROW_BT3), inv_b)

    # stage 4:  W_uv2 -> BN4 -> ReLU                                    (B,128)
    h = jnp.dot(a.astype(jnp.bfloat16), w_ref[:, COL_W4:COL_W4 + LANE],
                preferred_element_type=jnp.float32) + row(ROW_B4)
    a = _bn_relu(h, row(ROW_G4), row(ROW_BT4), inv_b)

    # stage 5:  W_uv3 -> lane-dense (B,128) store; real score is column 0
    out_ref[...] = jnp.dot(a.astype(jnp.bfloat16), w_ref[:, COL_W5:COL_W5 + LANE],
                           preferred_element_type=jnp.float32) + row(ROW_B5)


def prepare_params(params, d=EMBED_DIM, h=HIDDEN2):
    """Pack every weight / bias / BN parameter into ONE bf16 lane-dense slab.

    Done once, outside the forward path.  Stage-2 is folded into stage-3 here
    (exact f32 math at pack time).
    """
    d2 = 2 * d
    f32 = jnp.float32

    # PyTorch Linear weights are (out,in); transpose to (in,out) for x @ W.
    w_ur1t = params["w_ur1_w"].T
    w_vr1t = params["w_vr1_w"].T
    w_uv2t = params["w_uv2_w"].T
    w_uv3t = params["w_uv3_w"].T

    # fold the activation-free stage-2 into stage-3
    w2 = jnp.zeros((d2, d2), f32)
    w2 = w2.at[:d, :d].set(params["w_ur2_w"].T).at[d:, d:].set(params["w_vr2_w"].T)
    w_uv1t = params["w_uv1_w"].T                        # (2d, d)
    w23 = w2 @ w_uv1t                                   # (2d, d)
    b2 = jnp.concatenate([params["w_ur2_b"], params["w_vr2_b"]])
    b23 = b2 @ w_uv1t + params["w_uv1_b"]               # (d,)

    slab = jnp.zeros((LANE, W_SLAB_COLS), f32)
    slab = slab.at[0:d, COL_W1U:COL_W1U + d].set(w_ur1t)
    slab = slab.at[0:d, COL_W1V + d:COL_W1V + d2].set(w_vr1t)   # lane-shifted by d
    slab = slab.at[0:d2, COL_W23:COL_W23 + d].set(w23)
    slab = slab.at[0:d, COL_W4:COL_W4 + h].set(w_uv2t)
    slab = slab.at[0:h, COL_W5:COL_W5 + 1].set(w_uv3t)

    rows = jnp.zeros((N_ROWS, LANE), f32)
    rows = rows.at[ROW_B1, :d2].set(jnp.concatenate([params["w_ur1_b"], params["w_vr1_b"]]))
    rows = rows.at[ROW_G12, :d2].set(jnp.concatenate([params["bn1_g"], params["bn2_g"]]))
    rows = rows.at[ROW_BT12, :d2].set(jnp.concatenate([params["bn1_b"], params["bn2_b"]]))
    rows = rows.at[ROW_B23, :d].set(b23)
    rows = rows.at[ROW_G3, :d].set(params["bn3_g"])
    rows = rows.at[ROW_BT3, :d].set(params["bn3_b"])
    rows = rows.at[ROW_B4, :h].set(params["w_uv2_b"])
    rows = rows.at[ROW_G4, :h].set(params["bn4_g"])
    rows = rows.at[ROW_BT4, :h].set(params["bn4_b"])
    rows = rows.at[ROW_B5, 0].set(params["w_uv3_b"][0])
    slab = slab.at[0:N_ROWS, COL_R:COL_R + LANE].set(rows)

    # bf16 slab: single-pass MXU operands and half the parameter DMA.
    # gamma=1 / beta=0 are exact in bf16; padded gamma/beta stay exactly 0.
    return slab.astype(jnp.bfloat16)


@jax.jit
def mksf_forward(nodes_u, nodes_v, table_u, table_v, w_slab):
    """Full forward: encoder gather + fused MLP kernel + score extraction."""
    # TODO(synk): if the real encoder_u/encoder_v are large embedding tables,
    # move this gather into the kernel (PrefetchScalarGridSpec scalar indices
    # + manual DMA gather from pl.ANY refs) to drop the last non-Pallas ops.
    embeds_u = table_u[nodes_u]                 # (B, D)
    embeds_v = table_v[nodes_v]                 # (B, D)

    B = embeds_u.shape[0]
    vmem = pl.BlockSpec(memory_space=pltpu.MemorySpace.VMEM)
    # Gridless: the whole batch must live in one block because BatchNorm runs
    # in training mode (batch statistics).
    # TODO(synk): for large B (and to use the 2nd TensorCore on v7x), switch to
    # eval-mode/running-stat BN and add a batch grid with
    # dimension_semantics=("parallel",); re-derive VMEM budget vs v7x's 64 MiB.
    scores_pad = pl.pallas_call(
        mksf_kernel,
        out_shape=jax.ShapeDtypeStruct((B, LANE), jnp.float32),
        in_specs=[vmem, vmem, vmem],
        out_specs=vmem,
    )(embeds_u, embeds_v, w_slab)
    return scores_pad[:, 0]                     # == scores.squeeze() -> (B,)


def init_params(key, embed_dim=EMBED_DIM, hidden2=HIDDEN2):
    ks = jax.random.split(key, 16)
    d = embed_dim

    def lin(kw, kb, out_f, in_f):
        bound = 1.0 / jnp.sqrt(in_f)
        w = jax.random.uniform(kw, (out_f, in_f), jnp.float32, -bound, bound)
        b = jax.random.uniform(kb, (out_f,), jnp.float32, -bound, bound)
        return w, b

    p = {}
    p["w_ur1_w"], p["w_ur1_b"] = lin(ks[0], ks[1], d, d)
    p["w_ur2_w"], p["w_ur2_b"] = lin(ks[2], ks[3], d, d)
    p["w_vr1_w"], p["w_vr1_b"] = lin(ks[4], ks[5], d, d)
    p["w_vr2_w"], p["w_vr2_b"] = lin(ks[6], ks[7], d, d)
    p["w_uv1_w"], p["w_uv1_b"] = lin(ks[8], ks[9], d, 2 * d)
    p["w_uv2_w"], p["w_uv2_b"] = lin(ks[10], ks[11], hidden2, d)
    p["w_uv3_w"], p["w_uv3_b"] = lin(ks[12], ks[13], 1, hidden2)
    # BatchNorm1d default init: gamma = 1, beta = 0
    p["bn1_g"] = jnp.ones((d,), jnp.float32); p["bn1_b"] = jnp.zeros((d,), jnp.float32)
    p["bn2_g"] = jnp.ones((d,), jnp.float32); p["bn2_b"] = jnp.zeros((d,), jnp.float32)
    p["bn3_g"] = jnp.ones((d,), jnp.float32); p["bn3_b"] = jnp.zeros((d,), jnp.float32)
    p["bn4_g"] = jnp.ones((hidden2,), jnp.float32); p["bn4_b"] = jnp.zeros((hidden2,), jnp.float32)
    return p


def mksf_reference(embeds_u, embeds_v, p):
    """Plain-JAX replica of the original (unfused, full-f32) PyTorch forward."""
    hp = jax.lax.Precision.HIGHEST

    def lin(x, w, b):
        return jnp.dot(x, w.T, precision=hp) + b

    def bn_relu(x, g, b):
        m = jnp.mean(x, axis=0, keepdims=True)
        v = jnp.mean(jnp.square(x - m), axis=0, keepdims=True)
        return jnp.maximum((x - m) / jnp.sqrt(v + BN_EPS) * g + b, 0.0)

    x_u = bn_relu(lin(embeds_u, p["w_ur1_w"], p["w_ur1_b"]), p["bn1_g"], p["bn1_b"])
    x_u = lin(x_u, p["w_ur2_w"], p["w_ur2_b"])
    x_v = bn_relu(lin(embeds_v, p["w_vr1_w"], p["w_vr1_b"]), p["bn2_g"], p["bn2_b"])
    x_v = lin(x_v, p["w_vr2_w"], p["w_vr2_b"])
    x = jnp.concatenate([x_u, x_v], axis=1)
    x = bn_relu(lin(x, p["w_uv1_w"], p["w_uv1_b"]), p["bn3_g"], p["bn3_b"])
    x = bn_relu(lin(x, p["w_uv2_w"], p["w_uv2_b"]), p["bn4_g"], p["bn4_b"])
    return lin(x, p["w_uv3_w"], p["w_uv3_b"])[:, 0]


if __name__ == "__main__":
    key = jax.random.PRNGKey(0)
    k_tab_u, k_tab_v, k_nodes_u, k_nodes_v, k_params = jax.random.split(key, 5)

    batch = 8
    num_nodes = 20

    # encoder_u / encoder_v are opaque in the spec; modeled as embedding tables
    # whose integer gather runs inside the jitted wrapper.
    table_u = jax.random.normal(k_tab_u, (num_nodes, EMBED_DIM), jnp.float32)
    table_v = jax.random.normal(k_tab_v, (num_nodes, EMBED_DIM), jnp.float32)
    nodes_u = jax.random.randint(k_nodes_u, (batch,), 0, num_nodes)
    nodes_v = jax.random.randint(k_nodes_v, (batch,), 0, num_nodes)

    params = init_params(k_params)
    w_slab = prepare_params(params)             # packed once, reused every call

    scores = mksf_forward(nodes_u, nodes_v, table_u, table_v, w_slab)
    scores = jax.block_until_ready(scores)

    assert scores.shape == (batch,)
    assert bool(jnp.all(jnp.isfinite(scores)))

    # Cross-check the fused/packed bf16-MXU kernel against the exact f32
    # reference of the original module.  Tolerance reflects the deliberate
    # single-pass bf16 MXU operands (f32 accumulation); structural/packing
    # bugs would show up as O(1) errors and still fail this check.
    embeds_u = table_u[nodes_u]
    embeds_v = table_v[nodes_v]
    ref = mksf_reference(embeds_u, embeds_v, params)
    assert bool(jnp.allclose(scores, ref, rtol=5e-2, atol=1e-1))

    print("KERNEL_OK")
</pallas_src>

<mosaic_0001>
module attributes {stable_mosaic.version = 11 : i64} {
  func.func @mksf_kernel(%arg0: memref<8x32xf32, #tpu.memory_space<vmem>>, %arg1: memref<8x32xf32, #tpu.memory_space<vmem>>, %arg2: memref<128x768xbf16, #tpu.memory_space<vmem>>, %arg3: memref<8x128xf32, #tpu.memory_space<vmem>>) attributes {dimension_semantics = [], scalar_prefetch = 0 : i64, scratch_operands = 0 : i64, tpu.core_type = #tpu.core_type<tc>} {
    %c0 = arith.constant 0 : index
    %c640 = arith.constant 640 : index
    %0 = vector.load %arg2[%c0, %c640] : memref<128x768xbf16, #tpu.memory_space<vmem>>, vector<16x128xbf16>
    %1 = arith.extf %0 : vector<16x128xbf16> to vector<16x128xf32>
    %c0_0 = arith.constant 0 : index
    %c0_1 = arith.constant 0 : index
    %2 = vector.load %arg0[%c0_0, %c0_1] : memref<8x32xf32, #tpu.memory_space<vmem>>, vector<8x32xf32>
    %3 = arith.truncf %2 : vector<8x32xf32> to vector<8x32xbf16>
    %c0_2 = arith.constant 0 : index
    %c0_3 = arith.constant 0 : index
    %4 = vector.load %arg1[%c0_2, %c0_3] : memref<8x32xf32, #tpu.memory_space<vmem>>, vector<8x32xf32>
    %5 = arith.truncf %4 : vector<8x32xf32> to vector<8x32xbf16>
    %c0_4 = arith.constant 0 : index
    %c0_5 = arith.constant 0 : index
    %6 = vector.load %arg2[%c0_4, %c0_5] : memref<128x768xbf16, #tpu.memory_space<vmem>>, vector<32x128xbf16>
    %cst = arith.constant dense<0.000000e+00> : vector<8x128xf32>
    %7 = tpu.matmul %3, %6, %cst {dimension_numbers = #tpu.dot_dimension_numbers<[1], [0], [0], [1], [0, 0, 1, 1], [], []>} : vector<8x32xbf16>, vector<32x128xbf16>, vector<8x128xf32> -> vector<8x128xf32>
    %c0_6 = arith.constant 0 : index
    %c128 = arith.constant 128 : index
    %8 = vector.load %arg2[%c0_6, %c128] : memref<128x768xbf16, #tpu.memory_space<vmem>>, vector<32x128xbf16>
    %cst_7 = arith.constant dense<0.000000e+00> : vector<8x128xf32>
    %9 = tpu.matmul %5, %8, %cst_7 {dimension_numbers = #tpu.dot_dimension_numbers<[1], [0], [0], [1], [0, 0, 1, 1], [], []>} : vector<8x32xbf16>, vector<32x128xbf16>, vector<8x128xf32> -> vector<8x128xf32>
    %10 = arith.addf %7, %9 : vector<8x128xf32>
    %11 = vector.extract_strided_slice %1 {offsets = [0, 0], sizes = [1, 128], strides = [1, 1]} : vector<16x128xf32> to vector<1x128xf32>
    %12 = vector.broadcast %11 : vector<1x128xf32> to vector<8x128xf32>
    %13 = arith.addf %10, %12 : vector<8x128xf32>
    %14 = vector.extract_strided_slice %1 {offsets = [1, 0], sizes = [1, 128], strides = [1, 1]} : vector<16x128xf32> to vector<1x128xf32>
    %15 = vector.extract_strided_slice %1 {offsets = [2, 0], sizes = [1, 128], strides = [1, 1]} : vector<16x128xf32> to vector<1x128xf32>
    %16 = arith.mulf %13, %13 : vector<8x128xf32>
    %17 = tpu.concatenate %13, %16 in 1 : vector<8x128xf32>, vector<8x128xf32> -> vector<8x256xf32>
    %cst_8 = arith.constant dense<0.000000e+00> : vector<256xf32>
    %18 = vector.multi_reduction <add>, %17, %cst_8 [0] : vector<8x256xf32> to vector<256xf32>
    %19 = vector.shape_cast %18 : vector<256xf32> to vector<1x256xf32>
    %cst_9 = arith.constant 1.250000e-01 : f32
    %20 = vector.broadcast %cst_9 : f32 to vector<1x256xf32>
    %21 = arith.mulf %19, %20 : vector<1x256xf32>
    %22 = vector.extract_strided_slice %21 {offsets = [0, 0], sizes = [1, 128], strides = [1, 1]} : vector<1x256xf32> to vector<1x128xf32>
    %23 = vector.extract_strided_slice %21 {offsets = [0, 128], sizes = [1, 128], strides = [1, 1]} : vector<1x256xf32> to vector<1x128xf32>
    %24 = arith.mulf %22, %22 : vector<1x128xf32>
    %25 = arith.subf %23, %24 : vector<1x128xf32>
    %cst_10 = arith.constant 0.000000e+00 : f32
    %26 = vector.broadcast %cst_10 : f32 to vector<1x128xf32>
    %27 = arith.maximumf %25, %26 : vector<1x128xf32>
    %28 = vector.broadcast %22 : vector<1x128xf32> to vector<8x128xf32>
    %29 = arith.subf %13, %28 : vector<8x128xf32>
    %cst_11 = arith.constant 9.99999974E-6 : f32
    %30 = vector.broadcast %cst_11 : f32 to vector<1x128xf32>
    %31 = arith.addf %27, %30 : vector<1x128xf32>
    %32 = math.rsqrt %31 : vector<1x128xf32>
    %33 = vector.broadcast %32 : vector<1x128xf32> to vector<8x128xf32>
    %34 = arith.mulf %29, %33 : vector<8x128xf32>
    %35 = vector.broadcast %14 : vector<1x128xf32> to vector<8x128xf32>
    %36 = arith.mulf %34, %35 : vector<8x128xf32>
    %37 = vector.broadcast %15 : vector<1x128xf32> to vector<8x128xf32>
    %38 = arith.addf %36, %37 : vector<8x128xf32>
    %cst_12 = arith.constant 0.000000e+00 : f32
    %39 = vector.broadcast %cst_12 : f32 to vector<8x128xf32>
    %40 = arith.maximumf %38, %39 : vector<8x128xf32>
    %41 = arith.truncf %40 : vector<8x128xf32> to vector<8x128xbf16>
    %c0_13 = arith.constant 0 : index
    %c256 = arith.constant 256 : index
    %42 = vector.load %arg2[%c0_13, %c256] : memref<128x768xbf16, #tpu.memory_space<vmem>>, vector<128x128xbf16>
    %cst_14 = arith.constant dense<0.000000e+00> : vector<8x128xf32>
    %43 = tpu.matmul %41, %42, %cst_14 {dimension_numbers = #tpu.dot_dimension_numbers<[1], [0], [0], [1], [0, 0, 1, 1], [], []>} : vector<8x128xbf16>, vector<128x128xbf16>, vector<8x128xf32> -> vector<8x128xf32>
    %44 = vector.extract_strided_slice %1 {offsets = [3, 0], sizes = [1, 128], strides = [1, 1]} : vector<16x128xf32> to vector<1x128xf32>
    %45 = vector.broadcast %44 : vector<1x128xf32> to vector<8x128xf32>
    %46 = arith.addf %43, %45 : vector<8x128xf32>
    %47 = vector.extract_strided_slice %1 {offsets = [4, 0], sizes = [1, 128], strides = [1, 1]} : vector<16x128xf32> to vector<1x128xf32>
    %48 = vector.extract_strided_slice %1 {offsets = [5, 0], sizes = [1, 128], strides = [1, 1]} : vector<16x128xf32> to vector<1x128xf32>
    %49 = arith.mulf %46, %46 : vector<8x128xf32>
    %50 = tpu.concatenate %46, %49 in 1 : vector<8x128xf32>, vector<8x128xf32> -> vector<8x256xf32>
    %cst_15 = arith.constant dense<0.000000e+00> : vector<256xf32>
    %51 = vector.multi_reduction <add>, %50, %cst_15 [0] : vector<8x256xf32> to vector<256xf32>
    %52 = vector.shape_cast %51 : vector<256xf32> to vector<1x256xf32>
    %cst_16 = arith.constant 1.250000e-01 : f32
    %53 = vector.broadcast %cst_16 : f32 to vector<1x256xf32>
    %54 = arith.mulf %52, %53 : vector<1x256xf32>
    %55 = vector.extract_strided_slice %54 {offsets = [0, 0], sizes = [1, 128], strides = [1, 1]} : vector<1x256xf32> to vector<1x128xf32>
    %56 = vector.extract_strided_slice %54 {offsets = [0, 128], sizes = [1, 128], strides = [1, 1]} : vector<1x256xf32> to vector<1x128xf32>
    %57 = arith.mulf %55, %55 : vector<1x128xf32>
    %58 = arith.subf %56, %57 : vector<1x128xf32>
    %cst_17 = arith.constant 0.000000e+00 : f32
    %59 = vector.broadcast %cst_17 : f32 to vector<1x128xf32>
    %60 = arith.maximumf %58, %59 : vector<1x128xf32>
    %61 = vector.broadcast %55 : vector<1x128xf32> to vector<8x128xf32>
    %62 = arith.subf %46, %61 : vector<8x128xf32>
    %cst_18 = arith.constant 9.99999974E-6 : f32
    %63 = vector.broadcast %cst_18 : f32 to vector<1x128xf32>
    %64 = arith.addf %60, %63 : vector<1x128xf32>
    %65 = math.rsqrt %64 : vector<1x128xf32>
    %66 = vector.broadcast %65 : vector<1x128xf32> to vector<8x128xf32>
    %67 = arith.mulf %62, %66 : vector<8x128xf32>
    %68 = vector.broadcast %47 : vector<1x128xf32> to vector<8x128xf32>
    %69 = arith.mulf %67, %68 : vector<8x128xf32>
    %70 = vector.broadcast %48 : vector<1x128xf32> to vector<8x128xf32>
    %71 = arith.addf %69, %70 : vector<8x128xf32>
    %cst_19 = arith.constant 0.000000e+00 : f32
    %72 = vector.broadcast %cst_19 : f32 to vector<8x128xf32>
    %73 = arith.maximumf %71, %72 : vector<8x128xf32>
    %74 = arith.truncf %73 : vector<8x128xf32> to vector<8x128xbf16>
    %c0_20 = arith.constant 0 : index
    %c384 = arith.constant 384 : index
    %75 = vector.load %arg2[%c0_20, %c384] : memref<128x768xbf16, #tpu.memory_space<vmem>>, vector<128x128xbf16>
    %cst_21 = arith.constant dense<0.000000e+00> : vector<8x128xf32>
    %76 = tpu.matmul %74, %75, %cst_21 {dimension_numbers = #tpu.dot_dimension_numbers<[1], [0], [0], [1], [0, 0, 1, 1], [], []>} : vector<8x128xbf16>, vector<128x128xbf16>, vector<8x128xf32> -> vector<8x128xf32>
    %77 = vector.extract_strided_slice %1 {offsets = [6, 0], sizes = [1, 128], strides = [1, 1]} : vector<16x128xf32> to vector<1x128xf32>
    %78 = vector.broadcast %77 : vector<1x128xf32> to vector<8x128xf32>
    %79 = arith.addf %76, %78 : vector<8x128xf32>
    %80 = vector.extract_strided_slice %1 {offsets = [7, 0], sizes = [1, 128], strides = [1, 1]} : vector<16x128xf32> to vector<1x128xf32>
    %81 = vector.extract_strided_slice %1 {offsets = [8, 0], sizes = [1, 128], strides = [1, 1]} : vector<16x128xf32> to vector<1x128xf32>
    %82 = arith.mulf %79, %79 : vector<8x128xf32>
    %83 = tpu.concatenate %79, %82 in 1 : vector<8x128xf32>, vector<8x128xf32> -> vector<8x256xf32>
    %cst_22 = arith.constant dense<0.000000e+00> : vector<256xf32>
    %84 = vector.multi_reduction <add>, %83, %cst_22 [0] : vector<8x256xf32> to vector<256xf32>
    %85 = vector.shape_cast %84 : vector<256xf32> to vector<1x256xf32>
    %cst_23 = arith.constant 1.250000e-01 : f32
    %86 = vector.broadcast %cst_23 : f32 to vector<1x256xf32>
    %87 = arith.mulf %85, %86 : vector<1x256xf32>
    %88 = vector.extract_strided_slice %87 {offsets = [0, 0], sizes = [1, 128], strides = [1, 1]} : vector<1x256xf32> to vector<1x128xf32>
    %89 = vector.extract_strided_slice %87 {offsets = [0, 128], sizes = [1, 128], strides = [1, 1]} : vector<1x256xf32> to vector<1x128xf32>
    %90 = arith.mulf %88, %88 : vector<1x128xf32>
    %91 = arith.subf %89, %90 : vector<1x128xf32>
    %cst_24 = arith.constant 0.000000e+00 : f32
    %92 = vector.broadcast %cst_24 : f32 to vector<1x128xf32>
    %93 = arith.maximumf %91, %92 : vector<1x128xf32>
    %94 = vector.broadcast %88 : vector<1x128xf32> to vector<8x128xf32>
    %95 = arith.subf %79, %94 : vector<8x128xf32>
    %cst_25 = arith.constant 9.99999974E-6 : f32
    %96 = vector.broadcast %cst_25 : f32 to vector<1x128xf32>
    %97 = arith.addf %93, %96 : vector<1x128xf32>
    %98 = math.rsqrt %97 : vector<1x128xf32>
    %99 = vector.broadcast %98 : vector<1x128xf32> to vector<8x128xf32>
    %100 = arith.mulf %95, %99 : vector<8x128xf32>
    %101 = vector.broadcast %80 : vector<1x128xf32> to vector<8x128xf32>
    %102 = arith.mulf %100, %101 : vector<8x128xf32>
    %103 = vector.broadcast %81 : vector<1x128xf32> to vector<8x128xf32>
    %104 = arith.addf %102, %103 : vector<8x128xf32>
    %cst_26 = arith.constant 0.000000e+00 : f32
    %105 = vector.broadcast %cst_26 : f32 to vector<8x128xf32>
    %106 = arith.maximumf %104, %105 : vector<8x128xf32>
    %107 = arith.truncf %106 : vector<8x128xf32> to vector<8x128xbf16>
    %c0_27 = arith.constant 0 : index
    %c512 = arith.constant 512 : index
    %108 = vector.load %arg2[%c0_27, %c512] : memref<128x768xbf16, #tpu.memory_space<vmem>>, vector<128x128xbf16>
    %cst_28 = arith.constant dense<0.000000e+00> : vector<8x128xf32>
    %109 = tpu.matmul %107, %108, %cst_28 {dimension_numbers = #tpu.dot_dimension_numbers<[1], [0], [0], [1], [0, 0, 1, 1], [], []>} : vector<8x128xbf16>, vector<128x128xbf16>, vector<8x128xf32> -> vector<8x128xf32>
    %110 = vector.extract_strided_slice %1 {offsets = [9, 0], sizes = [1, 128], strides = [1, 1]} : vector<16x128xf32> to vector<1x128xf32>
    %111 = vector.broadcast %110 : vector<1x128xf32> to vector<8x128xf32>
    %112 = arith.addf %109, %111 : vector<8x128xf32>
    %c0_29 = arith.constant 0 : index
    %c0_30 = arith.constant 0 : index
    %113 = vector.load %arg3[%c0_29, %c0_30] : memref<8x128xf32, #tpu.memory_space<vmem>>, vector<8x128xf32>
    tpu.vector_store %arg3[%c0_29, %c0_30], %112 {strides = array<i32>} : memref<8x128xf32, #tpu.memory_space<vmem>>, vector<8x128xf32>,
    return
  }
}

</mosaic_0001>

<bundles_post_ra>
// kernel: mksf_forward.1
= control target key start
LH: loop header
LB: loop body
LE: loop exit
PB: predicated region body
PF: predicated region fallthrough
CT: control target
= control target key end

     0   :  { %8 = vsyncpa [#allocation3], 0  ;;  %s634_s15 = smov [#allocation2]   ;;  %s635_s17 = smov 384   ;;  %s679_s0 = inlined_call_operand.vmem [shape: f32[8,32], index: 0, kind: input, shape index: {}]   ;;  %s680_s1 = inlined_call_operand.vmem [shape: f32[8,32], index: 1, kind: input, shape index: {}]   ;;  %s681_s2 = inlined_call_operand.hbm [shape: bf16[128,768], index: 2, kind: input, shape index: {}]   ;;  %s682_s3 = inlined_call_operand.vmem [shape: f32[8,128], index: 3, kind: output, shape index: {}]  }
   0x1   :  { %s17_s14 = sshll.u32 %s681_s2, 4  ;;  %s19_s16 = sshll.u32 %s634_s15, 4  ;;  %s18_s14 = int_to_ptr.hbm [resolvable:$true] %s17_s14  ;;  %s20_s16 = int_to_ptr.vmem [resolvable:$true] %s19_s16 }
   0x2   :  { %s636_s18 = smov 24  }
   0x3   :  { %25 = dma.hbm_to_vmem [thread:$0]  %s18_s14, 6144, %s20_s16, [#allocation3], %s635_s17, %s635_s17, %s636_s18  }
   0x4   :  { %632 = dma.done.wait [#allocation3], 6144  }
   0x5   :  { %633 = vsyncadd [#allocation3], 4294961152  ;;  %v463_v0 = vld [vmem:[#allocation2 + $0x34] sm:$0xf]  ;;  %v574_v1 = vld [vmem:[#allocation2 + $0x48] sm:$0xf0] }
   0x6   :  { %v459_v2 = vld [vmem:[#allocation2 + $0x4] sm:$0xf]  ;;  %v464_v3 = vor.u32 %v574_v1, %v463_v0  ;;  %v573_v4 = vld [vmem:[#allocation2 + $0x18] sm:$0xf0]  ;;  %v472_v5 = vld [vmem:[#allocation2 + $0x30] sm:$0xf] }
   0x7   :  { %v572_v6 = vld [vmem:[#allocation2 + $0x44] sm:$0xf0]  ;;  %v460_v7 = vor.u32 %v573_v4, %v459_v2  ;;  %v37_v8 = vld [vmem:[%s680_s1] sm:$0xff]  ;;  %v571_v11 = vld [vmem:[#allocation2 + $0x14] sm:$0xf0]  ;;  %vm59_vm0 = vcmask 261120  }
   0x8   :  { %69 = vmatpush.bf16.msra.mxu1 %v464_v3  ;;  %v473_v9 = vor.u32 %v572_v6, %v472_v5  ;;  %v468_v10 = vld [vmem:[#allocation2] sm:$0xf]  ;;  %v38_v12 = vpack.c.bf16 %v37_v8, %v37_v8  ;;  %v505_v17 = vld [vmem:[#allocation2 + $0x158] sm:$0xf]  ;;  %v582_v18 = vld [vmem:[#allocation2 + $0x16c] sm:$0xf0] }
   0x9   :  { %v469_v13 = vor.u32 %v571_v11, %v468_v10  ;;  %v35_v14 = vld [vmem:[%s679_s0] sm:$0xff]  ;;  %v501_v19 = vld [vmem:[#allocation2 + $0x128] sm:$0xf]  ;;  %v506_v20 = vor.u32 %v582_v18, %v505_v17  ;;  %v497_v23 = vld [vmem:[#allocation2 + $0xf8] sm:$0xf] }
   0xa   :  { %v36_v15 = vpack.c.bf16 %v35_v14, %v35_v14  ;;  %v581_v21 = vld [vmem:[#allocation2 + $0x13c] sm:$0xf0]  ;;  %v580_v24 = vld [vmem:[#allocation2 + $0x10c] sm:$0xf0]  ;;  %v31_v26 = vld [vmem:[#allocation2 + $0x14] sm:$0xf] }
   0xb   :  { %208 = vmatpush.bf16.msra.mxu2 %v506_v20  ;;  %v502_v22 = vor.u32 %v581_v21, %v501_v19  ;;  %v498_v27 = vor.u32 %v580_v24, %v497_v23  ;;  %v493_v28 = vld [vmem:[#allocation2 + $0xc8] sm:$0xf]  ;;  %v579_v29 = vld [vmem:[#allocation2 + $0xdc] sm:$0xf0]  ;;  %v666_v30 = vunpack.c.l.bf16 %v31_v26  ;;  %v489_v32 = vld [vmem:[#allocation2 + $0x98] sm:$0xf] }
   0xc   :  { %70 = vmatpush.bf16.msra.mxu1 %v460_v7  ;;  %v494_v31 = vor.u32 %v579_v29, %v493_v28  ;;  %v578_v33 = vld [vmem:[#allocation2 + $0xac] sm:$0xf0]  ;;  %v485_v38 = vld [vmem:[#allocation2 + $0x68] sm:$0xf]  ;;  %v577_v39 = vld [vmem:[#allocation2 + $0x7c] sm:$0xf0] }
   0xd   :  { %v104_v34 = vperm.slane %v666_v30, 0  ;;  %v490_v36 = vor.u32 %v578_v33, %v489_v32  ;;  %v486_v41 = vor.u32 %v577_v39, %v485_v38  ;;  %v481_v44 = vld [vmem:[#allocation2 + $0x38] sm:$0xf]  ;;  %v576_v45 = vld [vmem:[#allocation2 + $0x4c] sm:$0xf0]  ;;  %v137_v11 = vperm.slane %v666_v30, 1 }
   0xe   :  { %v482_v49 = vor.u32 %v576_v45, %v481_v44  ;;  %v477_v52 = vld [vmem:[#allocation2 + $0x8] sm:$0xf]  ;;  %v575_v53 = vld [vmem:[#allocation2 + $0x1c] sm:$0xf0]  ;;  %v139_v14 = vperm.slane %v666_v30, 2  ;;  %v159_v32 = vperm.slane %v666_v30, 3 }
   0xf   :  { %465 = vmatmul.msk.bf16.vlgmr.msra.gmra.mxu1 %vm59_vm0, %v38_v12  ;;  %209 = vmatpush.bf16.msra.mxu2 %v502_v22  ;;  %v478_v56 = vor.u32 %v575_v53, %v477_v52  ;;  %v537_v19 = vld [vmem:[#allocation2 + $0x15c] sm:$0xf]  ;;  %v590_v20 = vld [vmem:[#allocation2 + $0x170] sm:$0xf0]  ;;  %v533_v21 = vld [vmem:[#allocation2 + $0x12c] sm:$0xf] }
  0x10   :  { %97 = vmatpush.bf16.msrb.mxu1 %v473_v9  ;;  %v538_v22 = vor.u32 %v590_v20, %v537_v19  ;;  %v589_v23 = vld [vmem:[#allocation2 + $0x140] sm:$0xf0]  ;;  %v588_v26 = vld [vmem:[#allocation2 + $0x110] sm:$0xf0]  ;;  %v525_v28 = vld [vmem:[#allocation2 + $0xcc] sm:$0xf] }
  0x11   :  { %v534_v24 = vor.u32 %v589_v23, %v533_v21  ;;  %v587_v29 = vld [vmem:[#allocation2 + $0xe0] sm:$0xf0]  ;;  %v521_v33 = vld [vmem:[#allocation2 + $0x9c] sm:$0xf]  ;;  %v517_v38 = vld [vmem:[#allocation2 + $0x6c] sm:$0xf] }
  0x12   :  { %323 = vmatpush.bf16.msra.mxu3 %v538_v22  ;;  %v585_v39 = vld [vmem:[#allocation2 + $0x80] sm:$0xf0]  ;;  %v513_v45 = vld [vmem:[#allocation2 + $0x3c] sm:$0xf]  ;;  %v509_v53 = vld [vmem:[#allocation2 + $0xc] sm:$0xf] }
  0x13   :  { %210 = vmatpush.bf16.msra.mxu2 %v498_v27  ;;  %v598_v19 = vld [vmem:[#allocation2 + $0x174] sm:$0xf0]  ;;  %v565_v20 = vld [vmem:[#allocation2 + $0x130] sm:$0xf]  ;;  %v597_v22 = vld [vmem:[#allocation2 + $0x144] sm:$0xf0] }
  0x14   :  { %98 = vmatpush.bf16.msrb.mxu1 %v469_v13  ;;  %v566_v23 = vor.u32 %v597_v22, %v565_v20 }
  0x16   :  { %324 = vmatpush.bf16.msra.mxu3 %v534_v24  ;;  %v561_v24 = vld [vmem:[#allocation2 + $0x100] sm:$0xf] }
  0x17   :  { %211 = vmatpush.bf16.msra.mxu2 %v494_v31  ;;  %v526_v31 = vor.u32 %v587_v29, %v525_v28  ;;  %v595_v28 = vld [vmem:[#allocation2 + $0xe4] sm:$0xf0] }
  0x1b   :  { %212 = vmatpush.bf16.msra.mxu2 %v490_v36 }
  0x1f   :  { %474 = vmatmul.msk.bf16.vlgmr.msrb.gmra.mxu1 %vm59_vm0, %v36_v15  ;;  %213 = vmatpush.bf16.msra.mxu2 %v486_v41 }
  0x23   :  { %214 = vmatpush.bf16.msra.mxu2 %v482_v49 }
  0x27   :  { %215 = vmatpush.bf16.msra.mxu2 %v478_v56 }
  0x8c   :  { %v72_v16 = vpop.f32.mrf.mxu1 }
  0x94   :  { %v74_v25 = vpop.f32.mrf.mxu1 }
  0x95   :  { %v529_v25 = vld [vmem:[#allocation2 + $0xfc] sm:$0xf] }
  0x96   :  { %v530_v27 = vor.u32 %v588_v26, %v529_v25  ;;  %v596_v25 = vld [vmem:[#allocation2 + $0x114] sm:$0xf0] }
  0x97   :  { %v562_v26 = vor.u32 %v596_v25, %v561_v24 }
  0x98   :  { %325 = vmatpush.bf16.msra.mxu3 %v530_v27  ;;  %v557_v27 = vld [vmem:[#allocation2 + $0xd0] sm:$0xf] }
  0x99   :  { %v558_v29 = vor.u32 %v595_v28, %v557_v27 }
  0x9c   :  { %v100_v35 = vpop.f32.mrf.mxu1  ;;  %326 = vmatpush.bf16.msra.mxu3 %v526_v31  ;;  %v274_v31 = vperm.slane %v666_v30, 6 }
  0x9d   :  { %v101_v37 = vadd.f32 %v100_v35, %v72_v16 }
  0x9f   :  { %v105_v40 = vadd.f32 %v104_v34, %v101_v37  ;;  %v586_v34 = vld [vmem:[#allocation2 + $0xb0] sm:$0xf0] }
  0xa0   :  { %v522_v36 = vor.u32 %v586_v34, %v521_v33  ;;  %v594_v33 = vld [vmem:[#allocation2 + $0xb4] sm:$0xf0] }
  0xa1   :  { %v106_v42 = vmul.f32 %v105_v40, %v105_v40  ;;  %v107_v43 = vrot.slane %v105_v40, 4 }
  0xa2   :  { %327 = vmatpush.bf16.msra.mxu3 %v522_v36 }
  0xa3   :  { %v108_v46 = vadd.f32 %v107_v43, %v105_v40  ;;  %v113_v47 = vrot.slane %v106_v42, 4 }
  0xa4   :  { %v102_v48 = vpop.f32.mrf.mxu1 }
  0xa5   :  { %v109_v50 = vrot.slane %v108_v46, 2  ;;  %v114_v51 = vadd.f32 %v113_v47, %v106_v42  ;;  %v518_v42 = vor.u32 %v585_v39, %v517_v38  ;;  %v593_v38 = vld [vmem:[#allocation2 + $0x84] sm:$0xf0] }
  0xa7   :  { %v110_v54 = vadd.f32 %v109_v50, %v108_v46  ;;  %v115_v55 = vrot.slane %v114_v51, 2  ;;  %v584_v46 = vld [vmem:[#allocation2 + $0x50] sm:$0xf0]  ;;  %328 = vmatpush.bf16.msra.mxu3 %v518_v42 }
  0xa8   :  { %v514_v50 = vor.u32 %v584_v46, %v513_v45  ;;  %v592_v45 = vld [vmem:[#allocation2 + $0x54] sm:$0xf0] }
  0xa9   :  { %v116_v57 = vadd.f32 %v115_v55, %v114_v51  ;;  %v111_v58 = vrot.slane %v110_v54, 1 }
  0xab   :  { %v117_v59 = vrot.slane %v116_v57, 1  ;;  %v112_v60 = vadd.f32 %v111_v58, %v110_v54  ;;  %v583_v54 = vld [vmem:[#allocation2 + $0x20] sm:$0xf0]  ;;  %329 = vmatpush.bf16.msra.mxu3 %v514_v50 }
  0xad   :  { %v118_v61 = vadd.f32 %v117_v59, %v116_v57  ;;  %v119_v62 = vmul.f32 0.125, %v112_v60  ;;  %v510_v57 = vor.u32 %v583_v54, %v509_v53  ;;  %v591_v53 = vld [vmem:[#allocation2 + $0x24] sm:$0xf0] }
  0xaf   :  { %v120_v63 = vmul.f32 0.125, %v118_v61  ;;  %v121_v0 = vmul.f32 %v119_v62, %v119_v62  ;;  %v124_v10 = vsub.f32 %v105_v40, %v119_v62  ;;  %330 = vmatpush.bf16.msra.mxu3 %v510_v57 }
  0xb1   :  { %v122_v1 = vsub.f32 %v120_v63, %v121_v0 }
  0xb3   :  { %v123_v2 = vmax.f32 %v122_v1, 0.0 }
  0xb5   :  { %v125_v3 = vadd.f32 1e-05, %v123_v2 }
  0xb7   :  { %602 = vrsqrt.f32 %v125_v3  ;;  %vm132_vm2 = vweird.f32 %v125_v3 }
  0xbd   :  { %v603_v4 = vpop.eup %602 }
  0xbe   :  { %v127_v5 = vmul.f32 %v603_v4, %v125_v3  ;;  %vm133_vm1 = vweird.f32 %v603_v4 }
  0xbf   :  { %vm134_vm3 = vmor %vm132_vm2, %vm133_vm1 }
  0xc0   :  { %v128_v6 = vmul.f32 %v603_v4, %v127_v5 }
  0xc2   :  { %v129_v7 = vmul.f32 0.5, %v128_v6 }
  0xc4   :  { %v130_v8 = vsub.f32 1.5, %v129_v7 }
  0xc6   :  { %v131_v9 = vmul.f32 %v603_v4, %v130_v8 }
  0xc8   :  { %v135_v12 = vsel %vm134_vm3, %v603_v4, %v131_v9 }
  0xc9   :  { %v136_v13 = vmul.f32 %v135_v12, %v124_v10  ;;  %v252_v10 = vperm.slane %v666_v30, 4 }
  0xcb   :  { %v138_v15 = vmul.f32 %v137_v11, %v136_v13  ;;  %v254_v13 = vperm.slane %v666_v30, 5 }
  0xcd   :  { %v140_v16 = vadd.f32 %v139_v14, %v138_v15 }
  0xcf   :  { %v141_v17 = vmax.f32 %v140_v16, 0.0 }
  0xd1   :  { %v142_v18 = vpack.c.bf16 %v141_v17, %v141_v17 }
  0xd3   :  { %216 = vmatmul.bf16.vlgmr.msra.gmra.mxu2 %v142_v18  ;;  %v569_v18 = vld [vmem:[#allocation2 + $0x160] sm:$0xf] }
  0xd4   :  { %v570_v21 = vor.u32 %v598_v19, %v569_v18 }
  0xd6   :  { %438 = vmatpush.bf16.msra.mxu0 %v570_v21 }
  0xda   :  { %439 = vmatpush.bf16.msra.mxu0 %v566_v23 }
  0xde   :  { %440 = vmatpush.bf16.msra.mxu0 %v562_v26 }
  0xe2   :  { %441 = vmatpush.bf16.msra.mxu0 %v558_v29 }
 0x156   :  { %v217_v35 = vpop.f32.mrf.mxu2 }
 0x157   :  { %v218_v37 = vadd.f32 %v217_v35, %v159_v32  ;;  %v553_v32 = vld [vmem:[#allocation2 + $0xa0] sm:$0xf] }
 0x158   :  { %v554_v35 = vor.u32 %v594_v33, %v553_v32 }
 0x159   :  { %v221_v40 = vmul.f32 %v218_v37, %v218_v37  ;;  %v222_v41 = vrot.slane %v218_v37, 4 }
 0x15a   :  { %442 = vmatpush.bf16.msra.mxu0 %v554_v35 }
 0x15b   :  { %v223_v43 = vadd.f32 %v222_v41, %v218_v37  ;;  %v228_v44 = vrot.slane %v221_v40, 4 }
 0x15d   :  { %v224_v47 = vrot.slane %v223_v43, 2  ;;  %v229_v48 = vadd.f32 %v228_v44, %v221_v40  ;;  %v545_v44 = vld [vmem:[#allocation2 + $0x40] sm:$0xf] }
 0x15e   :  { %v219_v49 = vpop.f32.mrf.mxu2 }
 0x15f   :  { %v225_v51 = vadd.f32 %v224_v47, %v223_v43  ;;  %v230_v52 = vrot.slane %v229_v48, 2  ;;  %v546_v49 = vor.u32 %v592_v45, %v545_v44 }
 0x161   :  { %v226_v55 = vrot.slane %v225_v51, 1  ;;  %v231_v56 = vadd.f32 %v230_v52, %v229_v48  ;;  %v541_v52 = vld [vmem:[#allocation2 + $0x10] sm:$0xf] }
 0x163   :  { %v232_v58 = vrot.slane %v231_v56, 1  ;;  %v227_v59 = vadd.f32 %v226_v55, %v225_v51 }
 0x165   :  { %v233_v60 = vadd.f32 %v232_v58, %v231_v56  ;;  %v234_v61 = vmul.f32 0.125, %v227_v59  ;;  %v542_v56 = vor.u32 %v591_v53, %v541_v52 }
 0x167   :  { %v235_v62 = vmul.f32 0.125, %v233_v60  ;;  %v236_v63 = vmul.f32 %v234_v61, %v234_v61  ;;  %v239_v9 = vsub.f32 %v218_v37, %v234_v61  ;;  %v549_v37 = vld [vmem:[#allocation2 + $0x70] sm:$0xf] }
 0x168   :  { %v550_v41 = vor.u32 %v593_v38, %v549_v37 }
 0x169   :  { %v237_v0 = vsub.f32 %v235_v62, %v236_v63 }
 0x16a   :  { %443 = vmatpush.bf16.msra.mxu0 %v550_v41 }
 0x16b   :  { %v238_v1 = vmax.f32 %v237_v0, 0.0 }
 0x16d   :  { %v240_v2 = vadd.f32 1e-05, %v238_v1 }
 0x16e   :  { %444 = vmatpush.bf16.msra.mxu0 %v546_v49 }
 0x16f   :  { %604 = vrsqrt.f32 %v240_v2  ;;  %vm247_vm5 = vweird.f32 %v240_v2 }
 0x172   :  { %445 = vmatpush.bf16.msra.mxu0 %v542_v56 }
 0x175   :  { %v605_v3 = vpop.eup %604 }
 0x176   :  { %v242_v4 = vmul.f32 %v605_v3, %v240_v2  ;;  %vm248_vm4 = vweird.f32 %v605_v3 }
 0x177   :  { %vm249_vm6 = vmor %vm247_vm5, %vm248_vm4 }
 0x178   :  { %v243_v5 = vmul.f32 %v605_v3, %v242_v4 }
 0x17a   :  { %v244_v6 = vmul.f32 0.5, %v243_v5  ;;  %v32_v5 = vld [vmem:[#allocation2 + $0x2c] sm:$0xf] }
 0x17c   :  { %v245_v7 = vsub.f32 1.5, %v244_v6 }
 0x17e   :  { %v246_v8 = vmul.f32 %v605_v3, %v245_v7 }
 0x180   :  { %v250_v11 = vsel %vm249_vm6, %v605_v3, %v246_v8  ;;  %v34_v8 = vunpack.c.l.bf16 %v32_v5 }
 0x181   :  { %v251_v12 = vmul.f32 %v250_v11, %v239_v9  ;;  %v367_v11 = vperm.slane %v666_v30, 7 }
 0x182   :  { %v389_v19 = vperm.slane %v34_v8, 1 }
 0x183   :  { %v253_v14 = vmul.f32 %v252_v10, %v251_v12 }
 0x185   :  { %v255_v15 = vadd.f32 %v254_v13, %v253_v14  ;;  %v369_v14 = vperm.slane %v34_v8, 0 }
 0x187   :  { %v256_v16 = vmax.f32 %v255_v15, 0.0 }
 0x189   :  { %v257_v17 = vpack.c.bf16 %v256_v16, %v256_v16 }
 0x18b   :  { %331 = vmatmul.bf16.vlgmr.msra.gmra.mxu3 %v257_v17 }
 0x20e   :  { %v332_v34 = vpop.f32.mrf.mxu3 }
 0x20f   :  { %v333_v36 = vadd.f32 %v332_v34, %v274_v31 }
 0x211   :  { %v336_v39 = vmul.f32 %v333_v36, %v333_v36  ;;  %v337_v40 = vrot.slane %v333_v36, 4 }
 0x213   :  { %v338_v42 = vadd.f32 %v337_v40, %v333_v36  ;;  %v343_v43 = vrot.slane %v336_v39, 4 }
 0x215   :  { %v339_v46 = vrot.slane %v338_v42, 2  ;;  %v344_v47 = vadd.f32 %v343_v43, %v336_v39 }
 0x216   :  { %v334_v48 = vpop.f32.mrf.mxu3 }
 0x217   :  { %v340_v50 = vadd.f32 %v339_v46, %v338_v42  ;;  %v345_v51 = vrot.slane %v344_v47, 2 }
 0x219   :  { %v341_v54 = vrot.slane %v340_v50, 1  ;;  %v346_v55 = vadd.f32 %v345_v51, %v344_v47 }
 0x21b   :  { %v347_v57 = vrot.slane %v346_v55, 1  ;;  %v342_v58 = vadd.f32 %v341_v54, %v340_v50 }
 0x21d   :  { %v348_v59 = vadd.f32 %v347_v57, %v346_v55  ;;  %v349_v60 = vmul.f32 0.125, %v342_v58 }
 0x21f   :  { %v350_v61 = vmul.f32 0.125, %v348_v59  ;;  %v351_v62 = vmul.f32 %v349_v60, %v349_v60  ;;  %v354_v10 = vsub.f32 %v333_v36, %v349_v60 }
 0x221   :  { %v352_v63 = vsub.f32 %v350_v61, %v351_v62 }
 0x223   :  { %v353_v0 = vmax.f32 %v352_v63, 0.0 }
 0x225   :  { %v355_v1 = vadd.f32 1e-05, %v353_v0 }
 0x227   :  { %606 = vrsqrt.f32 %v355_v1  ;;  %vm362_vm8 = vweird.f32 %v355_v1 }
 0x22d   :  { %v607_v2 = vpop.eup %606 }
 0x22e   :  { %v357_v3 = vmul.f32 %v607_v2, %v355_v1  ;;  %vm363_vm7 = vweird.f32 %v607_v2 }
 0x22f   :  { %vm364_vm9 = vmor %vm362_vm8, %vm363_vm7 }
 0x230   :  { %v358_v4 = vmul.f32 %v607_v2, %v357_v3 }
 0x232   :  { %v359_v6 = vmul.f32 0.5, %v358_v4 }
 0x234   :  { %v360_v7 = vsub.f32 1.5, %v359_v6 }
 0x236   :  { %v361_v9 = vmul.f32 %v607_v2, %v360_v7 }
 0x238   :  { %v365_v12 = vsel %vm364_vm9, %v607_v2, %v361_v9 }
 0x239   :  { %v366_v13 = vmul.f32 %v365_v12, %v354_v10 }
 0x23b   :  { %v368_v15 = vmul.f32 %v367_v11, %v366_v13 }
 0x23d   :  { %v370_v16 = vadd.f32 %v369_v14, %v368_v15 }
 0x23f   :  { %v371_v17 = vmax.f32 %v370_v16, 0.0 }
 0x241   :  { %v372_v18 = vpack.c.bf16 %v371_v17, %v371_v17 }
 0x243   :  { %446 = vmatmul.bf16.vlgmr.msra.gmra.mxu0 %v372_v18 }
 0x2c0   :  { %v447_v20 = vpop.f32.mrf.mxu0 }
 0x2c1   :  { %v448_v21 = vadd.f32 %v447_v20, %v389_v19 }
 0x2c3   :  { %451 = vst [vmem:[%s682_s3] sm:$0xff] %v448_v21 }
 0x2c8   :  { %v449_v22 = vpop.f32.mrf.mxu0 }
 0x2c9   :  { %456 = vsyncpa [#allocation3], 1 }

</bundles_post_ra>
